<compile_context>
chip_gen: v6e
topology: v6e:2x2x1
jax: 0.10.0
libtpu: 0.0.40
codegen_flags: <defaults>
</compile_context>

<pallas_src>
import functools
import math

import jax
import jax.numpy as jnp
from jax.experimental import pallas as pl
from jax.experimental.pallas import tpu as pltpu

_LANE = 128
_VMEM_LIMIT = 32 * 1024 * 1024  # explicit scoped-VMEM limit, valid on v5e/v6e/v7x


def _round_up(n, m):
    return (n + m - 1) // m * m


def _sublane_packing(dtype):
    # Rows per packed sublane group: 8 for f32, 16 for bf16, 32 for int8/fp8.
    return max(8, 32 // jnp.dtype(dtype).itemsize)


def _tile_bytes_target():
    """Per-input-tile byte budget; 6 double-buffered tiles must fit scoped VMEM."""
    try:
        vmem = getattr(pltpu.get_tpu_info(), "vmem_capacity_bytes", None)
        if vmem is not None and vmem <= 64 * 1024 * 1024:
            # v7x-class: ~3.2 TB/s HBM wants bigger tiles; 6 x 2 MiB = 12 MiB
            # still fits the 32 MiB scoped default of the 64 MiB part.
            return 2 * 1024 * 1024
    except Exception:
        pass
    # v5e/v6e: 1 MiB tiles already sit near the HBM roofline and 6 MiB of
    # buffering fits v5e's 16 MiB scoped-VMEM default.
    return 1 * 1024 * 1024


# --------------------------------------------------------------------------- #
# Kernels
# --------------------------------------------------------------------------- #
def _swiglu_kernel(a_ref, g_ref, o_ref):
    a = a_ref[...].astype(jnp.float32)
    g = g_ref[...].astype(jnp.float32)
    # jax.nn.sigmoid keeps the single-pass EUP logistic form.
    o_ref[...] = (a * (g * jax.nn.sigmoid(g))).astype(o_ref.dtype)


def _swiglu_fused_kernel(half, x_ref, o_ref):
    # Non-lane-aligned halves: stream x once and split inside the kernel
    # (the lane shuffle is cheap; the kernel is HBM-bound).
    x = x_ref[...].astype(jnp.float32)
    a = x[:, :half]
    g = x[:, half:]
    o_ref[...] = (a * (g * jax.nn.sigmoid(g))).astype(o_ref.dtype)


# --------------------------------------------------------------------------- #
# Tile selection
# --------------------------------------------------------------------------- #
def _ensure_min_blocks(M, half, tm, tn, packing):
    """Give the grid >=2 blocks so both v7x TensorCores can be used."""
    while pl.cdiv(M, tm) * (half // tn) < 2 and tn > _LANE:
        tn //= 2  # stays a multiple of 128 and a divisor of half
    if pl.cdiv(M, tm) * (half // tn) < 2 and tm >= 2 * packing:
        tm = _round_up(tm // 2, packing)
    return tm, tn


def _pick_tiles_lane_split(M, half, itemsize, packing):
    """(tm, tn) for the lane-split fast path, or (None, None) if `half` is not
    a multiple of 128 (the gate offset must land on a whole feature block)."""
    tn = None
    for cand in (2048, 1024, 512, 256, 128):
        if half % cand == 0:
            tn = cand
            break
    if tn is None:
        return None, None
    target = _tile_bytes_target()
    tm = max(packing, target // (tn * itemsize) // packing * packing)
    tm = min(tm, 4096, _round_up(M, packing))  # don't buffer rows that don't exist
    return _ensure_min_blocks(M, half, tm, tn, packing)


def _pick_tile_fused(M, C, itemsize, packing):
    target = _tile_bytes_target()
    tm = max(packing, target // (C * itemsize) // packing * packing)
    return min(tm, 4096, _round_up(M, packing))


def _pick_tiles_sublane_split(half, T, itemsize, packing):
    """(ts, tn) for the sublane-split path, or (None, None) if `half` is not
    sublane-packed (caller falls back to a transpose)."""
    if half % packing != 0:
        return None, None
    tn = T if T <= 2048 else 2048  # full trailing dim, or a 128-multiple tile
    target = _tile_bytes_target()
    want = max(packing, target // (tn * itemsize) // packing * packing)
    s = min(half, want) // packing * packing
    while s > packing and half % s != 0:
        s -= packing
    ts = max(packing, s)
    return ts, tn


# --------------------------------------------------------------------------- #
# pallas_call wrappers
# --------------------------------------------------------------------------- #
def _cost(n_in_elems, n_out_elems, itemsize):
    return pl.CostEstimate(
        flops=4 * n_out_elems,
        transcendentals=n_out_elems,
        bytes_accessed=(n_in_elems + n_out_elems) * itemsize,
    )


def _swiglu_lane_split(x2d, tm, tn):
    M, C = x2d.shape
    half = C // 2
    gn = half // tn
    return pl.pallas_call(
        _swiglu_kernel,
        out_shape=jax.ShapeDtypeStruct((M, half), x2d.dtype),
        grid_spec=pltpu.PrefetchScalarGridSpec(
            num_scalar_prefetch=0,
            grid=(pl.cdiv(M, tm), gn),
            in_specs=[
                # Both halves are DMA views of the SAME HBM array; the gate
                # view's index_map is offset by `gn` feature blocks.
                pl.BlockSpec((tm, tn), lambda i, j: (i, j)),
                pl.BlockSpec((tm, tn), lambda i, j, _gn=gn: (i, j + _gn)),
            ],
            out_specs=pl.BlockSpec((tm, tn), lambda i, j: (i, j)),
        ),
        compiler_params=pltpu.CompilerParams(
            dimension_semantics=("parallel", "parallel"),
            vmem_limit_bytes=_VMEM_LIMIT,
        ),
        cost_estimate=_cost(M * C, M * half, x2d.dtype.itemsize),
    )(x2d, x2d)


def _swiglu_fused(x2d, tm):
    M, C = x2d.shape
    half = C // 2
    return pl.pallas_call(
        functools.partial(_swiglu_fused_kernel, half),
        out_shape=jax.ShapeDtypeStruct((M, half), x2d.dtype),
        grid_spec=pltpu.PrefetchScalarGridSpec(
            num_scalar_prefetch=0,
            grid=(pl.cdiv(M, tm),),
            in_specs=[pl.BlockSpec((tm, C), lambda i: (i, 0))],
            out_specs=pl.BlockSpec((tm, half), lambda i: (i, 0)),
        ),
        compiler_params=pltpu.CompilerParams(
            dimension_semantics=("parallel",),
            vmem_limit_bytes=_VMEM_LIMIT,
        ),
        cost_estimate=_cost(M * C, M * half, x2d.dtype.itemsize),
    )(x2d)


def _swiglu_sublane_split(x3, ts, tn):
    P, S, T = x3.shape
    half = S // 2
    gs = half // ts
    return pl.pallas_call(
        _swiglu_kernel,
        out_shape=jax.ShapeDtypeStruct((P, half, T), x3.dtype),
        grid_spec=pltpu.PrefetchScalarGridSpec(
            num_scalar_prefetch=0,
            grid=(P, gs, pl.cdiv(T, tn)),
            in_specs=[
                pl.BlockSpec((1, ts, tn), lambda b, i, j: (b, i, j)),
                pl.BlockSpec((1, ts, tn), lambda b, i, j, _gs=gs: (b, i + _gs, j)),
            ],
            out_specs=pl.BlockSpec((1, ts, tn), lambda b, i, j: (b, i, j)),
        ),
        compiler_params=pltpu.CompilerParams(
            dimension_semantics=("parallel", "parallel", "parallel"),
            vmem_limit_bytes=_VMEM_LIMIT,
        ),
        cost_estimate=_cost(P * S * T, P * half * T, x3.dtype.itemsize),
    )(x3, x3)


# --------------------------------------------------------------------------- #
# Public API
# --------------------------------------------------------------------------- #
def swiglu(x, dim=-1):
    """SwiGLU: split x along `dim` into (a, gate); return a * silu(gate)."""
    dim = dim % x.ndim
    size = x.shape[dim]
    if size % 2 != 0:
        # TODO(synk): the PyTorch odd-size branch ([ceil, floor] split + broadcast)
        # is only well-defined for degenerate sizes; not lowered to Pallas.
        raise NotImplementedError("SwiGLU Pallas kernel requires an even split dim.")
    half = size // 2
    out_shape = x.shape[:dim] + (half,) + x.shape[dim + 1:]
    if x.size == 0:
        return jnp.zeros(out_shape, x.dtype)

    itemsize = jnp.dtype(x.dtype).itemsize
    packing = _sublane_packing(x.dtype)

    if dim == x.ndim - 1:
        M = math.prod(x.shape[:-1])
        x2d = x.reshape(M, size)
        tm, tn = _pick_tiles_lane_split(M, half, itemsize, packing)
        if tn is not None:
            y = _swiglu_lane_split(x2d, tm, tn)
        else:
            y = _swiglu_fused(x2d, _pick_tile_fused(M, size, itemsize, packing))
        return y.reshape(out_shape)

    # Split axis is not last: fold to (prefix, size, suffix) (pure reshape, no
    # transpose) and split along the sublane axis with a 3D BlockSpec.
    prefix = math.prod(x.shape[:dim])
    suffix = math.prod(x.shape[dim + 1:])
    ts, tn = _pick_tiles_sublane_split(half, suffix, itemsize, packing)
    if ts is not None:
        y3 = _swiglu_sublane_split(x.reshape(prefix, size, suffix), ts, tn)
        return y3.reshape(out_shape)

    # Last resort (half not sublane-packed): transpose the split axis to the
    # lane axis. Costs two extra HBM passes; rare for real model shapes.
    xm = jnp.moveaxis(x, dim, -1)
    return jnp.moveaxis(swiglu(xm, dim=-1), -1, dim)


class SwiGLU:
    """Mirror of the PyTorch module: SwiGLU(x) = a * SiLU(gate)."""

    def __init__(self, dim=-1):
        self.dim = dim

    def __call__(self, x):
        return swiglu(x, self.dim)


# --------------------------------------------------------------------------- #
# Self-test
# --------------------------------------------------------------------------- #
def _reference(x, dim=-1):
    a, g = jnp.split(x, 2, axis=dim)
    return a * (g * jax.nn.sigmoid(g))


if __name__ == "__main__":
    key = jax.random.PRNGKey(0)

    # 1) Lane-aligned split on the last axis (DMA-split fast path).
    x1 = jax.random.normal(key, (2, 8, 256), jnp.float32)
    y1 = jax.block_until_ready(SwiGLU(dim=-1)(x1))
    assert y1.shape == (2, 8, 128)
    assert jnp.allclose(y1, _reference(x1, -1), atol=1e-5, rtol=1e-5)

    # 2) Non-lane-aligned half -> in-kernel split fallback (single HBM pass).
    x2 = jax.random.normal(jax.random.PRNGKey(1), (2, 8, 64), jnp.float32)
    y2 = jax.block_until_ready(swiglu(x2))
    assert jnp.allclose(y2, _reference(x2, -1), atol=1e-5, rtol=1e-5)

    # 3) Ragged token count -> masked partial last row block (no wrapper pad).
    x3 = jax.random.normal(jax.random.PRNGKey(2), (3, 5, 256), jnp.float32)
    y3 = jax.block_until_ready(swiglu(x3))
    assert jnp.allclose(y3, _reference(x3, -1), atol=1e-5, rtol=1e-5)

    # 4) Split on a non-last axis -> sublane-split 3D path (no moveaxis).
    x4 = jax.random.normal(jax.random.PRNGKey(3), (2, 32, 16, 16), jnp.float32)
    y4 = jax.block_until_ready(SwiGLU(dim=1)(x4))
    assert y4.shape == (2, 16, 16, 16)
    assert jnp.allclose(y4, _reference(x4, 1), atol=1e-5, rtol=1e-5)

    # 5) bf16 activations -> 16-row sublane packing.
    x5 = jax.random.normal(jax.random.PRNGKey(4), (4, 8, 256), jnp.bfloat16)
    y5 = jax.block_until_ready(swiglu(x5))
    assert jnp.allclose(y5.astype(jnp.float32),
                        _reference(x5.astype(jnp.float32), -1),
                        atol=2e-2, rtol=2e-2)

    print("KERNEL_OK")
</pallas_src>

<mosaic_0001>
module attributes {stable_mosaic.version = 11 : i64} {
  func.func @_swiglu_kernel(%arg0: i32, %arg1: i32, %arg2: memref<8x128xf32, #tpu.memory_space<vmem>>, %arg3: memref<8x128xf32, #tpu.memory_space<vmem>>, %arg4: memref<8x128xf32, #tpu.memory_space<vmem>>) attributes {dimension_semantics = [#tpu.dimension_semantics<parallel>, #tpu.dimension_semantics<parallel>], iteration_bounds = array<i64: 2, 1>, scalar_prefetch = 0 : i64, scratch_operands = 0 : i64, tpu.core_type = #tpu.core_type<tc>, window_params = [{transform_indices = @transform_0, window_bounds = array<i64: 8, 128>}, {transform_indices = @transform_1, window_bounds = array<i64: 8, 128>}, {transform_indices = @transform_2, window_bounds = array<i64: 8, 128>}]} {
    %c0 = arith.constant 0 : index
    %c0_0 = arith.constant 0 : index
    %0 = vector.load %arg2[%c0, %c0_0] : memref<8x128xf32, #tpu.memory_space<vmem>>, vector<8x128xf32>
    %c0_1 = arith.constant 0 : index
    %c0_2 = arith.constant 0 : index
    %1 = vector.load %arg3[%c0_1, %c0_2] : memref<8x128xf32, #tpu.memory_space<vmem>>, vector<8x128xf32>
    %2 = arith.negf %1 : vector<8x128xf32>
    %3 = math.exp %2 : vector<8x128xf32>
    %cst = arith.constant 1.000000e+00 : f32
    %4 = vector.broadcast %cst : f32 to vector<8x128xf32>
    %5 = arith.addf %4, %3 : vector<8x128xf32>
    %6 = arith.divf %4, %5 : vector<8x128xf32>
    %7 = arith.mulf %1, %6 : vector<8x128xf32>
    %8 = arith.mulf %0, %7 : vector<8x128xf32>
    %c0_3 = arith.constant 0 : index
    %c0_4 = arith.constant 0 : index
    %9 = vector.load %arg4[%c0_3, %c0_4] : memref<8x128xf32, #tpu.memory_space<vmem>>, vector<8x128xf32>
    tpu.vector_store %arg4[%c0_3, %c0_4], %8 {strides = array<i32>} : memref<8x128xf32, #tpu.memory_space<vmem>>, vector<8x128xf32>,
    return
  }
  func.func @transform_0(%arg0: i32, %arg1: i32) -> (i32, i32) {
    %c0_i32 = arith.constant 0 : i32
    return %arg0, %arg1 : i32, i32
  }
  func.func @transform_1(%arg0: i32, %arg1: i32) -> (i32, i32) {
    %c1_i32 = arith.constant 1 : i32
    %0 = arith.addi %arg1, %c1_i32 : i32
    %c0_i32 = arith.constant 0 : i32
    return %arg0, %0 : i32, i32
  }
  func.func @transform_2(%arg0: i32, %arg1: i32) -> (i32, i32) {
    %c0_i32 = arith.constant 0 : i32
    return %arg0, %arg1 : i32, i32
  }
}

</mosaic_0001>

<bundles_post_ra>
// kernel: tpu_custom_call.1
= control target key start
LH: loop header
LB: loop body
LE: loop exit
PB: predicated region body
PF: predicated region fallthrough
CT: control target
= control target key end

     0   :  { %7 = vsyncpa [#allocation3], 0  ;;  %s769_s0 = inlined_call_operand.hbm [shape: f32[16,256], index: 0, kind: input, shape index: {}]   ;;  %s770_s1 = inlined_call_operand.hbm [shape: f32[16,256], index: 1, kind: input, shape index: {}]   ;;  %s771_s2 = inlined_call_operand.hbm [shape: f32[16,128], index: 2, kind: output, shape index: {}]  }
   0x1   :  { %9 = vsyncpa [#allocation3 + $0x1], 0 }
   0x2   :  { %10 = vsyncpa [#allocation6], 0 }
   0x3   :  { %12 = vsyncpa [#allocation6 + $0x1], 0 }
   0x4   :  { %13 = vsyncpa [#allocation4], 0 }
   0x5   :  { %15 = vsyncpa [#allocation4 + $0x1], 0  ;;  %s608_s9 = smov 0   ;;  %s610_s10 = smov 0  }
   0x6   :  { %s612_s11 = smov 0   ;;  %s614_s12 = smov 0  }
   0x7   :  { %s616_s13 = smov 0   ;;  %s618_s14 = smov 0  }
   0x8 LB: > { %s355_s15 = sadd.s32 4294967295, %s588_s14   ;;  %s356_s16 = sadd.s32 4294967294, %s588_s14   ;;  %s588_s14 = sphi %s618_s14, %s21_s14   ;;  %s584_s13 = sphi %s616_s13, %s783_s13   ;;  %s580_s12 = sphi %s614_s12, %s782_s12   ;;  %s576_s11 = sphi %s612_s11, %s781_s11   ;;  %s572_s10 = sphi %s610_s10, %s780_s10   ;;  %s568_s9 = sphi %s608_s9, %s779_s9  }
   0x9   : > { %s33_s17 = sadd.s32 1, %s584_s13  ;;  %s42_s18 = sadd.s32 1, %s576_s11 }
   0xa   : > { %p35_p0 = scmp.ge.s32.totalorder %s33_s17, 2  ;;  %p49_p1 = scmp.ne.s32.totalorder %s576_s11, %s572_s10 }
   0xb   : > { %p50_p2 = scmp.eq.s32.totalorder %s588_s14, 0  ;;  %p55_p3 = scmp.ne.s32.totalorder %s572_s10, %s568_s9 }
   0xc   : > { %s785_s17 = smov (%p35_p0, %s33_s17), 0  ;;  %p56_p5 = scmp.eq.s32.totalorder %s355_s15, 0 }
   0xd   : > { %p649_p4 = por %p50_p2, %p49_p1  ;;  %s37_s20 = ssub.s32 %s584_s13, %s785_s17 }
   0xe   : > { %p111_p6 = scmp.eq.s32.totalorder %s355_s15, 1  ;;  %p40_p7 = scmp.eq.s32.totalorder %s37_s20, 0 }
   0xf   : > { %p655_p8 = por %p56_p5, %p55_p3  ;;  %p117_p10 = scmp.eq.s32.totalorder %s356_s16, 1 }
  0x10   : > { %p659_p9 = por %p111_p6, %p49_p1  ;;  %p393_p13 = scmp.lt.s32.totalorder %s588_s14, 2 }
  0x11   : > { %s664_s23 = scalar_select %p40_p7, %s576_s11, %s42_s18  }
  0x12   : > { %p666_p11 = por %p117_p10, %p55_p3  ;;  %s673_s25 = sand.u32 1, %s576_s11  }
  0x13   : > { %s359_s26 = sshll.u32 %s673_s25, 3  ;;  %s374_s27 = sshll.u32 %s584_s13, 8 }
  0x14   : > { %s148_s30 = scalar_lea.hbm %s769_s0, %s374_s27  ;;  %s141_s3 = scalar_lea.vmem [#allocation2], %s359_s26 }
  0x15   : > { %s150_s4 = sshll.u32 %s141_s3, 4  ;;  %p682_p0 = pnand %p393_p13, %p649_p4  ;;  %s151_s4 = int_to_ptr.vmem [resolvable:$true] %s150_s4 }
  0x16   : > { %p365_p1 = scmp.ge.s32.totalorder %s588_s14, 1  ;;  %p176_p2 = scmp.lt.s32.totalorder %s588_s14, 3 }
  0x17   : > { %s138_s6 = scalar_lea.sflag [#allocation3], %s673_s25  ;;  %p449_p3 = pneg %p682_p0 }
  0x18   : > { %s460_s7 = scalar_lea.vmem %s151_s4, 128  ;;  %s590_s8 = smov [#allocation2]  }
  0x19   : > { %p461_p5 = scmp.ne.s32.totalorder %s151_s4, %s460_s7  ;;  %s465_s15 = sshll.u32 %s590_s8, 4  ;;  %s466_s15 = int_to_ptr.vmem [resolvable:$false] %s465_s15 }
  0x1a   : > { %s467_s16 = scalar_lea.vmem %s466_s15, 256  ;;  %p468_p4 = scmp.lt.s32.totalorder %s151_s4, %s466_s15 }
  0x1b   : > { %p463_p6 = pnand %p461_p5, %p449_p3  ;;  %p469_p10 = scmp.lt.s32.totalorder %s467_s16, %s460_s7 }
  0x1d   : > { %p464_p7 = pneg %p463_p6  ;;  %p470_p13 = por %p469_p10, %p468_p4 }
  0x1f   : > { %p471_p12 = pnand %p470_p13, %p464_p7 }
  0x21   : > { %474 = shalt.err (!%p471_p12)
}
  0x22   : > { %385 = dma.hbm_to_vmem [thread:$0]  (!%p682_p0), %s148_s30, 128, %s151_s4, %s138_s6  }
  0x23   : > { %p700_p5 = pnand %p365_p1, %p176_p2  ;;  %s288_s28 = scalar_lea.hbm %s770_s1, %s374_s27 }
  0x24   : > { %s161_s29 = scalar_lea.vmem [#allocation5], %s359_s26  ;;  %s289_s7 = scalar_lea.hbm %s288_s28, 128 }
  0x25   : > { %s171_s3 = sshll.u32 %s161_s29, 4  ;;  %s158_s8 = scalar_lea.sflag [#allocation6], %s673_s25  ;;  %s172_s3 = int_to_ptr.vmem [resolvable:$true] %s171_s3 }
  0x26   : > { %s488_s15 = scalar_lea.vmem %s172_s3, 128  ;;  %s591_s30 = smov [#allocation5]  }
  0x27   : > { %p489_p12 = scmp.ne.s32.totalorder %s172_s3, %s488_s15  ;;  %s493_s4 = sshll.u32 %s591_s30, 4  ;;  %s494_s4 = int_to_ptr.vmem [resolvable:$false] %s493_s4 }
  0x28   : > { %s495_s6 = scalar_lea.vmem %s494_s4, 256  ;;  %p496_p1 = scmp.lt.s32.totalorder %s172_s3, %s494_s4 }
  0x29   : > { %p491_p6 = pnand %p489_p12, %p449_p3  ;;  %p497_p2 = scmp.lt.s32.totalorder %s495_s6, %s488_s15 }
  0x2b   : > { %p492_p7 = pneg %p491_p6  ;;  %p498_p4 = por %p497_p2, %p496_p1 }
  0x2d   : > { %p499_p10 = pnand %p498_p4, %p492_p7 }
  0x2f   : > { %502 = shalt.err (!%p499_p10)
}
  0x30   : > { %388 = dma.hbm_to_vmem [thread:$0]  (!%p682_p0), %s289_s7, 128, %s172_s3, %s158_s8  }
  0x31   : > { %180 = sbr.rel (%p700_p5) target bundleno = 107 (0x6b), region = 28  ;;  %s716_s25 = sand.u32 (!%p700_p5), 1, %s572_s10  }
  0x32   : > { %s366_s26 = sshll.u32 (!%p700_p5), %s716_s25, 3  ;;  %s183_s27 = scalar_lea.sflag (!%p700_p5), [#allocation3], %s716_s25 }
  0x33   : > { %s186_s16 = scalar_lea.vmem (!%p700_p5), [#allocation2], %s366_s26 }
  0x36   : > { %555 = dma.done.wait (%p655_p8), %s183_s27, 128  }
  0x37   : > { %557 = vsyncadd (%p655_p8), %s183_s27, 4294967168  ;;  %s192_s5 = scalar_lea.sflag [#allocation6], %s716_s25  ;;  %s195_s19 = scalar_lea.vmem [#allocation5], %s366_s26 }
  0x38   : > { %559 = dma.done.wait (%p655_p8), %s192_s5, 128  }
  0x39   : > { %561 = vsyncadd (%p655_p8), %s192_s5, 4294967168  ;;  %v223_v0 = vld [vmem:[%s195_s19] sm:$0xff]  ;;  %v222_v5 = vld [vmem:[%s186_s16] sm:$0xff]  ;;  %s220_s18 = scalar_lea.vmem [#allocation7], %s366_s26  ;;  %s371_s28 = sshll.u32 %s580_s12, 7 }
  0x3a   : > { %v369_v1 = vmul.f32 -1.442695, %v223_v0  ;;  %s248_s20 = sshll.u32 %s220_s18, 4  ;;  %s246_s3 = scalar_lea.hbm %s771_s2, %s371_s28  ;;  %s249_s20 = int_to_ptr.vmem [resolvable:$true] %s248_s20 }
  0x3b   : > { %s234_s7 = scalar_lea.sflag [#allocation4], %s716_s25  ;;  %s504_s8 = scalar_lea.vmem %s249_s20, 128 }
  0x3c   : > { %443 = vpow2.f32 %v369_v1  ;;  %p505_p8 = scmp.ne.s32.totalorder %s249_s20, %s504_s8  ;;  %s592_s15 = smov [#allocation7]  }
  0x3d   : > { %s508_s30 = sshll.u32 %s592_s15, 4  ;;  %s509_s30 = int_to_ptr.vmem [resolvable:$false] %s508_s30 }
  0x3e   : > { %p506_p0 = pnand %p505_p8, %p659_p9  ;;  %s510_s4 = scalar_lea.vmem %s509_s30, 256 }
  0x3f   : > { %p511_p13 = scmp.lt.s32.totalorder %s249_s20, %s509_s30  ;;  %p512_p5 = scmp.lt.s32.totalorder %s510_s4, %s504_s8 }
  0x40   : > { %p507_p3 = pneg %p506_p0 }
  0x41   : > { %p513_p12 = por %p512_p5, %p511_p13 }
  0x43   : > { %p514_p6 = pnand %p513_p12, %p507_p3 }
  0x49   : > { %v444_v2 = vpop.eup %443 }
  0x4a   : > { %v227_v3 = vadd.f32 1.0, %v444_v2 }
  0x4c   : > { %445 = vrcp.f32 %v227_v3 }
  0x59   : > { %v446_v4 = vpop.eup %445 }
  0x5a   : > { %v230_v6 = vmul.f32 %v446_v4, %v223_v0 }
  0x5c   : > { %v231_v7 = vmul.f32 %v230_v6, %v222_v5 }
  0x5e   : > { %232 = vst [vmem:[%s220_s18] sm:$0xff] %v231_v7 }
  0x5f   : > { %517 = shalt.err (!%p514_p6)
}
  0x60   : > { %s518_s12 = scalar_lea.hbm %s246_s3, 128  ;;  %s522_s26 = scalar_lea.hbm %s771_s2, 256 }
  0x61   : > { %p519_p7 = scmp.ne.s32.totalorder %s246_s3, %s518_s12  ;;  %p523_p4 = scmp.lt.s32.totalorder %s246_s3, %s771_s2 }
  0x62   : > { %p524_p10 = scmp.lt.s32.totalorder %s522_s26, %s518_s12 }
  0x63   : > { %p520_p1 = pnand %p519_p7, %p659_p9 }
  0x64   : > { %p525_p8 = por %p524_p10, %p523_p4 }
  0x65   : > { %p521_p2 = pneg %p520_p1 }
  0x67   : > { %p526_p0 = pnand %p525_p8, %p521_p2 }
  0x69   : > { %529 = shalt.err (!%p526_p0)
}
  0x6a   : > { %380 = dma.vmem_to_hbm [thread:$0]  (%p659_p9), %s249_s20, 128, %s246_s3, %s234_s7  }
  0x6b PF: > { %s260_s5 = sand.u32 1, %s568_s9   ;;  %p778_p3 = scmp.ge.s32.totalorder %s588_s14, 2 }
  0x6c   : > { %s261_s19 = scalar_lea.sflag [#allocation4], %s260_s5 }
  0x6d   : > { %p390_p13 = pnand %p778_p3, %p666_p11 }
  0x6f   : > { %p391_p5 = pneg %p390_p13 }
  0x71   : > { %563 = dma.done.wait (%p391_p5), %s261_s19, 128  }
  0x72   : > { %565 = vsyncadd (%p391_p5), %s261_s19, 4294967168  ;;  %s21_s14 = sadd.s32 1, %s588_s14   ;;  %s779_s9 = smov %s572_s10 }
  0x73   : > { %p18_p12 = scmp.ge.s32.totalorder %s21_s14, 4   ;;  %s780_s10 = smov %s576_s11 }
  0x74   : > { %s781_s11 = smov %s664_s23  ;;  %s782_s12 = smov %s584_s13 }
  0x75   : > { %s783_s13 = smov %s785_s17  ;;  %20 = sbr.rel (!%p18_p12) target bundleno = 8 (0x8), region = 86 }
  0x7a   :  { %266 = vsyncpa [#allocation3], 1 }
  0x7b   :  { %268 = vsyncpa [#allocation3 + $0x1], 1 }
  0x7c   :  { %269 = vsyncpa [#allocation6], 1 }
  0x7d   :  { %271 = vsyncpa [#allocation6 + $0x1], 1 }
  0x7e   :  { %272 = vsyncpa [#allocation4], 1 }
  0x7f   :  { %274 = vsyncpa [#allocation4 + $0x1], 1 }

</bundles_post_ra>
